<compile_context>
chip_gen: v7x
topology: tpu7x:2x2x1
jax: 0.10.0
libtpu: 0.0.40
codegen_flags: <defaults>
</compile_context>

<pallas_src>
import jax
import jax.numpy as jnp
from jax.experimental import pallas as pl
from jax.experimental.pallas import tpu as pltpu

MASK = -1.0

_LANE = 128
_SUBLANE = 8
# Total double-buffered VMEM budget for (input block + output block).
_VMEM_BUDGET_BYTES = 24 * 1024 * 1024
_VMEM_LIMIT_BYTES = 32 * 1024 * 1024


def _round_up(x, m):
    return ((x + m - 1) // m) * m


def _sum_pool_kernel(x_ref, o_ref):
    # x_ref: (TR, L) in the input's native dtype; accumulate in f32.
    x = x_ref[...].astype(jnp.float32)
    x = jnp.where(x == jnp.float32(MASK), jnp.float32(0.0), x)
    o_ref[...] = jnp.sum(x, axis=-1, keepdims=True).astype(o_ref.dtype)


def _choose_row_tile(R, L, itemsize):
    # Resident bytes per row: input lanes pad to round_up(L, 128) and the
    # (TR, 1) output block pads to 128 lanes; both are double-buffered.
    padded_row_bytes = (_round_up(L, _LANE) + _LANE) * itemsize
    tr = _VMEM_BUDGET_BYTES // (2 * padded_row_bytes)
    tr = max(_SUBLANE, (tr // _SUBLANE) * _SUBLANE)
    return min(tr, _round_up(R, _SUBLANE))


def sum_pooling(sims, *, row_tile=None):
    assert sims.ndim == 3, "expected (B, N, L)"
    B, N, L = sims.shape
    R = B * N
    x2d = sims.reshape(R, L)                     # keep native dtype on the wire

    itemsize = jnp.dtype(x2d.dtype).itemsize
    TR = row_tile if row_tile is not None else _choose_row_tile(R, L, itemsize)
    assert TR % _SUBLANE == 0, "row tile must be a multiple of 8 sublanes"
    num_tiles = -(-R // TR)                      # ceil div
    R_pad = num_tiles * TR

    if R_pad != R:
        # Pad tail rows with MASK so they reduce to a well-defined 0 (sliced
        # away below) instead of reading undefined VMEM contents.
        pad = jnp.full((R_pad - R, L), MASK, dtype=x2d.dtype)
        x2d = jnp.concatenate([x2d, pad], axis=0)

    # TODO(synk): if L ever becomes huge enough that even a TR=8 block busts
    # the VMEM budget, add an "arbitrary" L grid axis with a VMEM accumulator
    # and pl.when init/finalize; not needed for typical L.
    out2d = pl.pallas_call(
        _sum_pool_kernel,
        out_shape=jax.ShapeDtypeStruct((R_pad, 1), sims.dtype),
        grid_spec=pltpu.PrefetchScalarGridSpec(
            num_scalar_prefetch=0,
            grid=(num_tiles,),
            in_specs=[pl.BlockSpec((TR, L), lambda i: (i, 0))],
            out_specs=pl.BlockSpec((TR, 1), lambda i: (i, 0)),
        ),
        compiler_params=pltpu.CompilerParams(
            dimension_semantics=("parallel",),   # megacore-shard rows on v7x
            vmem_limit_bytes=_VMEM_LIMIT_BYTES,
        ),
    )(x2d)

    return out2d[:R].reshape(B, N)


def _reference(sims):
    valid = sims != MASK
    return jnp.sum(jnp.where(valid, sims, jnp.zeros_like(sims)), axis=-1)


if __name__ == "__main__":
    key = jax.random.PRNGKey(0)

    # Case 1: (2, 4, 16) float32, automatic row tile.
    B, N, L = 2, 4, 16
    k1, k2, k3 = jax.random.split(key, 3)
    vals = jax.random.uniform(k1, (B, N, L), dtype=jnp.float32)
    lane = jnp.arange(L)[None, None, :]
    lens = jax.random.randint(k2, (B, N, 1), minval=4, maxval=L + 1)
    sims = jnp.where(lane < lens, vals, jnp.float32(MASK))

    out = sum_pooling(sims)
    jax.block_until_ready(out)
    assert out.shape == (B, N)
    assert out.dtype == sims.dtype
    assert jnp.allclose(out, _reference(sims), atol=1e-6, rtol=1e-6)

    # Case 2: (3, 5, 16) with a forced tiny row tile — R=15 exercises both the
    # multi-tile grid path and the MASK-padded tail-row path.
    B2, N2 = 3, 5
    vals2 = jax.random.uniform(k3, (B2, N2, L), dtype=jnp.float32)
    lens2 = jax.random.randint(k2, (B2, N2, 1), minval=1, maxval=L + 1)
    sims2 = jnp.where(lane < lens2, vals2, jnp.float32(MASK))

    out2 = sum_pooling(sims2, row_tile=8)
    jax.block_until_ready(out2)
    assert out2.shape == (B2, N2)
    assert jnp.allclose(out2, _reference(sims2), atol=1e-6, rtol=1e-6)

    print("KERNEL_OK")
</pallas_src>

<mosaic_0001>
module attributes {stable_mosaic.version = 11 : i64} {
  func.func @_sum_pool_kernel(%arg0: i32, %arg1: memref<8x16xf32, #tpu.memory_space<vmem>>, %arg2: memref<8x1xf32, #tpu.memory_space<vmem>>) attributes {dimension_semantics = [#tpu.dimension_semantics<parallel>], iteration_bounds = array<i64: 1>, scalar_prefetch = 0 : i64, scratch_operands = 0 : i64, tpu.core_type = #tpu.core_type<tc>, window_params = [{transform_indices = @transform_0, window_bounds = array<i64: 8, 16>}, {transform_indices = @transform_1, window_bounds = array<i64: 8, 1>}]} {
    %c0 = arith.constant 0 : index
    %c0_0 = arith.constant 0 : index
    %0 = vector.load %arg1[%c0, %c0_0] : memref<8x16xf32, #tpu.memory_space<vmem>>, vector<8x16xf32>
    %cst = arith.constant -1.000000e+00 : f32
    %1 = vector.broadcast %cst : f32 to vector<8x16xf32>
    %2 = arith.cmpf oeq, %0, %1 : vector<8x16xf32>
    %cst_1 = arith.constant 0.000000e+00 : f32
    %3 = vector.broadcast %cst_1 : f32 to vector<8x16xf32>
    %4 = arith.select %2, %3, %0 : vector<8x16xi1>, vector<8x16xf32>
    %cst_2 = arith.constant dense<0.000000e+00> : vector<8xf32>
    %5 = vector.multi_reduction <add>, %4, %cst_2 [1] : vector<8x16xf32> to vector<8xf32>
    %6 = vector.shape_cast %5 : vector<8xf32> to vector<8x1xf32>
    %c0_3 = arith.constant 0 : index
    %c0_4 = arith.constant 0 : index
    %7 = vector.load %arg2[%c0_3, %c0_4] : memref<8x1xf32, #tpu.memory_space<vmem>>, vector<8x1xf32>
    tpu.vector_store %arg2[%c0_3, %c0_4], %6 {strides = array<i32>} : memref<8x1xf32, #tpu.memory_space<vmem>>, vector<8x1xf32>,
    return
  }
  func.func @transform_0(%arg0: i32) -> (i32, i32) {
    %c0_i32 = arith.constant 0 : i32
    %c0_i32_0 = arith.constant 0 : i32
    return %arg0, %c0_i32 : i32, i32
  }
  func.func @transform_1(%arg0: i32) -> (i32, i32) {
    %c0_i32 = arith.constant 0 : i32
    %c0_i32_0 = arith.constant 0 : i32
    return %arg0, %c0_i32 : i32, i32
  }
}

</mosaic_0001>

<bundles_post_ra>
// kernel: tpu_custom_call.1
= control target key start
LH: loop header
LB: loop body
LE: loop exit
PB: predicated region body
PF: predicated region fallthrough
CT: control target
= control target key end

     0   :  { %6 = vsyncpa [#allocation3], 0  ;;  %s59_s6 = smov [#allocation2]   ;;  %s85_s0 = inlined_call_operand.hbm [shape: f32[8,16], index: 0, kind: input, shape index: {}]   ;;  %s86_s1 = inlined_call_operand.vmem [shape: f32[8,1], index: 1, kind: output, shape index: {}]  }
   0x1   :  { %s13_s7 = sshll.u32 %s59_s6, 4  ;;  %s35_s10 = scalar_lea.hbm %s85_s0, 128  ;;  %s14_s7 = int_to_ptr.vmem [resolvable:$true] %s13_s7 }
   0x2   :  { %p36_p0 = scmp.ne.s32.totalorder %s85_s0, %s35_s10  ;;  %p39_p1 = scmp.lt.u32.totalorder %s35_s10, %s85_s0 }
   0x4   :  { %p41_p2 = pnand %p39_p1, %p36_p0 }
   0x6   :  { %44 = shalt.err (!%p41_p2)
}
   0x7   :  { %s45_s15 = scalar_lea.vmem %s14_s7, 128  ;;  %p50_p4 = scmp.lt.s32.totalorder %s14_s7, %s14_s7 }
   0x8   :  { %p46_p3 = scmp.ne.s32.totalorder %s14_s7, %s45_s15  ;;  %p51_p5 = scmp.lt.s32.totalorder %s45_s15, %s45_s15 }
   0xa   :  { %p52_p6 = por %p51_p5, %p50_p4 }
   0xc   :  { %p53_p7 = pnand %p52_p6, %p46_p3 }
   0xe   :  { %56 = shalt.err (!%p53_p7)
}
   0xf   :  { %16 = dma.hbm_to_vmem [thread:$0]  %s85_s0, 128, %s14_s7, [#allocation3]  }
  0x10   :  { %57 = dma.done.wait [#allocation3], 128  }
  0x11   :  { %58 = vsyncadd [#allocation3], 4294967168  ;;  %v20_v0 = vld [vmem:[#allocation2] sm:$0xff]  ;;  %vm23_vm0 = vcmask 130048   ;;  %vm27_vm2 = vcmask 7168  }
  0x12   :  { %vm21_vm1 = vcmp.eq.f32.partialorder %v20_v0, -1.0 }
  0x13   :  { %v22_v1 = vsel %vm21_vm1, 0.0, %v20_v0 }
  0x14   :  { %v24_v2 = vsel %vm23_vm0, %v22_v1, 0.0 }
  0x15   :  { %25 = vadd.xlane.f32.xlu0 %v24_v2 }
  0xa2   :  { %v26_v3 = vpop.xlane.xlu0 %25 }
  0xa3   :  { %28 = vst.msk [vmem:[%s86_s1] sm:$0xff] %vm27_vm2, %v26_v3 }
  0xa4   :  { %33 = vsyncpa [#allocation3], 1 }

</bundles_post_ra>
